<compile_context>
chip_gen: v5e
topology: v5e:2x2
jax: 0.10.0
libtpu: 0.0.40
codegen_flags: <defaults>
</compile_context>

<pallas_src>
import functools

import jax
import jax.numpy as jnp
from jax.experimental import pallas as pl
from jax.experimental.pallas import tpu as pltpu

_EPS = 1e-5


def _vmem_capacity_bytes():
    """Trace-time VMEM capacity query with a conservative (v7x-sized) fallback."""
    try:
        return int(pltpu.get_tpu_info().vmem_capacity_bytes)
    except Exception:
        return 64 * 1024 * 1024


# --------------------------------------------------------------------------- #
# Pass 1: per-(batch, channel) sum / sum-of-squares for the BN half.
# --------------------------------------------------------------------------- #
def _bn_sums_kernel(x_ref, sum_ref, ssq_ref, *, lead_mask, lt, l_total,
                    mask_l, accumulate):
    # x_ref: (1, cc, lt)   sum_ref/ssq_ref: (1, cc, 1) per (batch, channel-chunk)
    x = x_ref[...].astype(jnp.float32)

    if lead_mask > 0:
        # First channel chunk contains a few leading InstanceNorm channels
        # (alignment superset) — zero them so they don't pollute BN stats.
        cidx = jax.lax.broadcasted_iota(jnp.int32, x.shape, 1)
        keep = (pl.program_id(1) > 0) | (cidx >= lead_mask)
        x = jnp.where(keep, x, 0.0)

    if mask_l:
        lidx = pl.program_id(2) * lt + jax.lax.broadcasted_iota(jnp.int32, x.shape, 2)
        x = jnp.where(lidx < l_total, x, 0.0)

    s = jnp.sum(x, axis=-1, keepdims=True)
    q = jnp.sum(x * x, axis=-1, keepdims=True)

    if accumulate:  # L is tiled → accumulate into the resident output block
        @pl.when(pl.program_id(2) == 0)
        def _():
            sum_ref[...] = jnp.zeros_like(sum_ref)
            ssq_ref[...] = jnp.zeros_like(ssq_ref)
        sum_ref[...] += s
        ssq_ref[...] += q
    else:
        sum_ref[...] = s
        ssq_ref[...] = q


# --------------------------------------------------------------------------- #
# Pass 2: fused normalization of both halves, writes final output directly.
# --------------------------------------------------------------------------- #
def _ibn_apply_kernel(x_ref, a_ref, b_ref, o_ref, *, half, eps):
    # x_ref/o_ref: (1, ct, L)   a_ref/b_ref: (ct, 1)
    #   c <  half : a = IN gamma, b = IN beta   (scale/shift built inline)
    #   c >= half : a = BN scale, b = BN shift  (precomputed from batch stats)
    x = x_ref[...].astype(jnp.float32)                       # (1, ct, L)
    inv_l = 1.0 / x.shape[-1]
    mean = jnp.sum(x, axis=-1, keepdims=True) * inv_l        # (1, ct, 1)
    msq = jnp.sum(x * x, axis=-1, keepdims=True) * inv_l
    var = jnp.maximum(msq - mean * mean, 0.0)                # single pass, no xc temp
    inv = jax.lax.rsqrt(var + eps)                           # EUP

    a = a_ref[...].astype(jnp.float32)[None]                 # (1, ct, 1)
    b = b_ref[...].astype(jnp.float32)[None]

    ct = a_ref.shape[0]
    ch = pl.program_id(1) * ct + jax.lax.broadcasted_iota(jnp.int32, (1, ct, 1), 1)
    is_in = ch < half

    scale = jnp.where(is_in, a * inv, a)                     # fold affine into
    shift = jnp.where(is_in, b - mean * scale, b)            # per-row scale/shift
    o_ref[...] = (x * scale + shift).astype(o_ref.dtype)     # 1 mul + 1 add / elem


# --------------------------------------------------------------------------- #
# Tiling planners.
# --------------------------------------------------------------------------- #
def _plan_stats(C, half, c2, L, itemsize, sub, budget):
    """Aligned channel window/chunking + optional L-tiling for the stats pass."""
    cand = [d for d in range(sub, c2 + 1, sub) if C % d == 0]
    if cand:
        fitting = [d for d in cand if d * L * itemsize <= budget]
        cc = max(fitting) if fitting else min(cand)
        k0 = half // cc                      # aligned superset start (chunk index)
    else:
        cc, k0 = C, 0                        # tiny / awkward C: full channel dim + mask
    lead_mask = half - k0 * cc               # leading IN channels inside first chunk
    cov_c = C - k0 * cc                      # covered channels (superset of BN half)
    ncc = cov_c // cc

    if cc * L * itemsize <= budget:          # contiguous full-L stripe (no mask)
        lt, nl, mask_l = L, 1, False
    else:                                    # only if even a minimal stripe is too big
        lt = max(128, (budget // (cc * itemsize)) // 128 * 128)
        lt = min(lt, L)
        nl = pl.cdiv(L, lt)
        mask_l = (L % lt) != 0
    return cc, k0, lead_mask, cov_c, ncc, lt, nl, mask_l


def _plan_apply_ct(C, L, itemsize, sub, budget, N, min_steps=8):
    """Channel tile for the apply pass (needs full L per block for IN stats)."""
    if C <= sub:
        return C
    bpc = L * itemsize                       # bytes per channel row
    max_ct = max(sub, min(C // sub * sub, (budget // bpc) // sub * sub))
    ct = max_ct
    # Keep enough grid steps to pipeline / shard across TensorCores (v7x),
    # but never shrink blocks below ~1 MiB just to manufacture steps.
    while (ct > sub and N * pl.cdiv(C, ct) < min_steps
           and max(sub, (ct // 2) // sub * sub) * bpc >= (1 << 20)):
        ct = max(sub, (ct // 2) // sub * sub)
    # Prefer an exact divisor of C close to ct (avoids a masked tail block);
    # otherwise keep the non-divisor tile — Pallas masks the tail block.
    for d in range(ct, max(sub - 1, ct * 3 // 4 - 1), -sub):
        if C % d == 0:
            return d
    return ct


def ibn_forward(x, in_gamma, in_beta, bn_gamma, bn_beta):
    """IBN forward.  x: (N, C, H, W) NCHW.  half = C // 2."""
    N, C, H, W = x.shape
    half = C // 2
    c2 = C - half
    L = H * W
    itemsize = jnp.dtype(x.dtype).itemsize
    sub = max(8, (4 // itemsize) * 8)            # sublane multiple for this dtype

    x3 = x.reshape(N, C, L)                      # free: merges trailing dims

    # Generation-aware VMEM budgets (v7x: 64 MiB physical; v5e/v6e: 128 MiB).
    cap = _vmem_capacity_bytes()
    base_limit = min(cap * 5 // 8, 64 << 20)
    temp_factor = 2 * max(1, 4 // itemsize)      # headroom for f32 block temporaries
    apply_budget = max(1 << 20, (base_limit - (8 << 20)) // (4 + temp_factor))
    stats_budget = max(1 << 20, (base_limit - (8 << 20)) // (2 + temp_factor))

    # ---------------- Pass 1: BN batch statistics -------------------------- #
    cc, k0, lead_mask, cov_c, ncc, lt, nl, mask_l = _plan_stats(
        C, half, c2, L, itemsize, sub, stats_budget)

    stats_block = cc * lt * itemsize
    stats_vmem = int(min(max(base_limit, (2 + temp_factor) * stats_block + (8 << 20)),
                         cap * 7 // 8))

    sums, ssqs = pl.pallas_call(
        functools.partial(_bn_sums_kernel, lead_mask=lead_mask, lt=lt,
                          l_total=L, mask_l=mask_l, accumulate=(nl > 1)),
        out_shape=(jax.ShapeDtypeStruct((N, cov_c, 1), jnp.float32),
                   jax.ShapeDtypeStruct((N, cov_c, 1), jnp.float32)),
        grid=(N, ncc, nl),
        in_specs=[pl.BlockSpec((1, cc, lt), lambda n, c, l: (n, k0 + c, l))],
        out_specs=(pl.BlockSpec((1, cc, 1), lambda n, c, l: (n, c, 0)),
                   pl.BlockSpec((1, cc, 1), lambda n, c, l: (n, c, 0))),
        compiler_params=pltpu.CompilerParams(
            dimension_semantics=("parallel", "parallel", "arbitrary"),
            vmem_limit_bytes=stats_vmem),
    )(x3)

    # Tiny epilogue in plain XLA: finish the batch reduction + per-channel math.
    bn_sum = jnp.sum(sums, axis=0)[lead_mask:]          # (c2, 1)
    bn_ssq = jnp.sum(ssqs, axis=0)[lead_mask:]

    cnt = float(N * L)
    bn_mean = bn_sum / cnt
    bn_var = jnp.maximum(bn_ssq / cnt - bn_mean * bn_mean, 0.0)
    bn_scale = bn_gamma.reshape(c2, 1).astype(jnp.float32) * jax.lax.rsqrt(bn_var + _EPS)
    bn_shift = bn_beta.reshape(c2, 1).astype(jnp.float32) - bn_mean * bn_scale

    a_col = jnp.concatenate(
        [in_gamma.reshape(half, 1).astype(jnp.float32), bn_scale], axis=0)   # (C, 1)
    b_col = jnp.concatenate(
        [in_beta.reshape(half, 1).astype(jnp.float32), bn_shift], axis=0)    # (C, 1)

    # ---------------- Pass 2: fused normalize + write final output --------- #
    ct = _plan_apply_ct(C, L, itemsize, sub, apply_budget, N)
    nchunks = pl.cdiv(C, ct)

    apply_block = ct * L * itemsize
    apply_vmem = int(min(max(base_limit, (4 + temp_factor) * apply_block + (8 << 20)),
                         cap * 7 // 8))
    # TODO(synk): if even a minimal (sub, L) block exceeds physical VMEM
    # (pathologically large H*W), a two-pass IN-stats path would be required.

    out3 = pl.pallas_call(
        functools.partial(_ibn_apply_kernel, half=half, eps=_EPS),
        out_shape=jax.ShapeDtypeStruct((N, C, L), x.dtype),
        grid=(N, nchunks),
        in_specs=[
            pl.BlockSpec((1, ct, L), lambda n, c: (n, c, 0)),
            pl.BlockSpec((ct, 1), lambda n, c: (c, 0)),
            pl.BlockSpec((ct, 1), lambda n, c: (c, 0)),
        ],
        out_specs=pl.BlockSpec((1, ct, L), lambda n, c: (n, c, 0)),
        compiler_params=pltpu.CompilerParams(
            dimension_semantics=("parallel", "parallel"),
            vmem_limit_bytes=apply_vmem),
    )(x3, a_col, b_col)

    return out3.reshape(N, C, H, W)


if __name__ == "__main__":
    key = jax.random.PRNGKey(0)
    N, C, H, W = 2, 4, 16, 16
    half = C // 2
    c2 = C - half

    kx, kg1, kb1, kg2, kb2 = jax.random.split(key, 5)
    x = jax.random.normal(kx, (N, C, H, W), dtype=jnp.float32)

    in_gamma = 1.0 + 0.1 * jax.random.normal(kg1, (half,), dtype=jnp.float32)
    in_beta = 0.1 * jax.random.normal(kb1, (half,), dtype=jnp.float32)
    bn_gamma = 1.0 + 0.1 * jax.random.normal(kg2, (c2,), dtype=jnp.float32)
    bn_beta = 0.1 * jax.random.normal(kb2, (c2,), dtype=jnp.float32)

    out = jax.jit(ibn_forward)(x, in_gamma, in_beta, bn_gamma, bn_beta)
    jax.block_until_ready(out)

    # Pure-JAX reference (InstanceNorm affine + train-mode BatchNorm).
    x1 = x[:, :half]
    m1 = x1.mean(axis=(2, 3), keepdims=True)
    v1 = ((x1 - m1) ** 2).mean(axis=(2, 3), keepdims=True)
    ref1 = (x1 - m1) / jnp.sqrt(v1 + _EPS) * in_gamma[None, :, None, None] \
        + in_beta[None, :, None, None]
    x2 = x[:, half:]
    m2 = x2.mean(axis=(0, 2, 3), keepdims=True)
    v2 = ((x2 - m2) ** 2).mean(axis=(0, 2, 3), keepdims=True)
    ref2 = (x2 - m2) / jnp.sqrt(v2 + _EPS) * bn_gamma[None, :, None, None] \
        + bn_beta[None, :, None, None]
    ref = jnp.concatenate([ref1, ref2], axis=1)
    assert jnp.max(jnp.abs(out - ref)) < 1e-4

    print("KERNEL_OK")
</pallas_src>

<mosaic_0001>
module attributes {stable_mosaic.version = 11 : i64} {
  func.func @_bn_sums_kernel(%arg0: i32, %arg1: i32, %arg2: i32, %arg3: memref<1x4x256xf32, #tpu.memory_space<vmem>>, %arg4: memref<1x4x1xf32, #tpu.memory_space<vmem>>, %arg5: memref<1x4x1xf32, #tpu.memory_space<vmem>>) attributes {dimension_semantics = [#tpu.dimension_semantics<parallel>, #tpu.dimension_semantics<parallel>, #tpu.dimension_semantics<arbitrary>], iteration_bounds = array<i64: 2, 1, 1>, scalar_prefetch = 0 : i64, scratch_operands = 0 : i64, tpu.core_type = #tpu.core_type<tc>, window_params = [{transform_indices = @transform_0, window_bounds = array<i64: 1, 4, 256>}, {transform_indices = @transform_1, window_bounds = array<i64: 1, 4, 1>}, {transform_indices = @transform_2, window_bounds = array<i64: 1, 4, 1>}]} {
    %c0 = arith.constant 0 : index
    %c0_0 = arith.constant 0 : index
    %c0_1 = arith.constant 0 : index
    %0 = vector.load %arg3[%c0, %c0_0, %c0_1] : memref<1x4x256xf32, #tpu.memory_space<vmem>>, vector<1x4x256xf32>
    %1 = tpu.iota {dimensions = array<i32: 1>} : vector<1x4x256xi32>
    %c0_i32 = arith.constant 0 : i32
    %2 = arith.cmpi sgt, %arg1, %c0_i32 : i32
    %c2_i32 = arith.constant 2 : i32
    %3 = vector.broadcast %c2_i32 : i32 to vector<1x4x256xi32>
    %4 = arith.cmpi sge, %1, %3 : vector<1x4x256xi32>
    %5 = vector.broadcast %2 : i1 to vector<1x4x256xi1>
    %6 = arith.ori %5, %4 : vector<1x4x256xi1>
    %cst = arith.constant 0.000000e+00 : f32
    %7 = vector.broadcast %cst : f32 to vector<1x4x256xf32>
    %8 = arith.select %6, %0, %7 : vector<1x4x256xi1>, vector<1x4x256xf32>
    %cst_2 = arith.constant dense<0.000000e+00> : vector<1x4xf32>
    %9 = vector.multi_reduction <add>, %8, %cst_2 [2] : vector<1x4x256xf32> to vector<1x4xf32>
    %10 = vector.shape_cast %9 : vector<1x4xf32> to vector<1x4x1xf32>
    %11 = arith.mulf %8, %8 : vector<1x4x256xf32>
    %cst_3 = arith.constant dense<0.000000e+00> : vector<1x4xf32>
    %12 = vector.multi_reduction <add>, %11, %cst_3 [2] : vector<1x4x256xf32> to vector<1x4xf32>
    %13 = vector.shape_cast %12 : vector<1x4xf32> to vector<1x4x1xf32>
    %c0_4 = arith.constant 0 : index
    %c0_5 = arith.constant 0 : index
    %c0_6 = arith.constant 0 : index
    %14 = vector.load %arg4[%c0_4, %c0_5, %c0_6] : memref<1x4x1xf32, #tpu.memory_space<vmem>>, vector<1x4x1xf32>
    tpu.vector_store %arg4[%c0_4, %c0_5, %c0_6], %10 {strides = array<i32>} : memref<1x4x1xf32, #tpu.memory_space<vmem>>, vector<1x4x1xf32>,
    %c0_7 = arith.constant 0 : index
    %c0_8 = arith.constant 0 : index
    %c0_9 = arith.constant 0 : index
    %15 = vector.load %arg5[%c0_7, %c0_8, %c0_9] : memref<1x4x1xf32, #tpu.memory_space<vmem>>, vector<1x4x1xf32>
    tpu.vector_store %arg5[%c0_7, %c0_8, %c0_9], %13 {strides = array<i32>} : memref<1x4x1xf32, #tpu.memory_space<vmem>>, vector<1x4x1xf32>,
    return
  }
  func.func @transform_0(%arg0: i32, %arg1: i32, %arg2: i32) -> (i32, i32, i32) {
    %c0_i32 = arith.constant 0 : i32
    %0 = arith.addi %c0_i32, %arg1 : i32
    %c0_i32_0 = arith.constant 0 : i32
    return %arg0, %0, %arg2 : i32, i32, i32
  }
  func.func @transform_1(%arg0: i32, %arg1: i32, %arg2: i32) -> (i32, i32, i32) {
    %c0_i32 = arith.constant 0 : i32
    %c0_i32_0 = arith.constant 0 : i32
    return %arg0, %arg1, %c0_i32 : i32, i32, i32
  }
  func.func @transform_2(%arg0: i32, %arg1: i32, %arg2: i32) -> (i32, i32, i32) {
    %c0_i32 = arith.constant 0 : i32
    %c0_i32_0 = arith.constant 0 : i32
    return %arg0, %arg1, %c0_i32 : i32, i32, i32
  }
}

module attributes {stable_mosaic.version = 11 : i64} {
  func.func @_ibn_apply_kernel(%arg0: i32, %arg1: i32, %arg2: memref<1x4x256xf32, #tpu.memory_space<vmem>>, %arg3: memref<4x1xf32, #tpu.memory_space<vmem>>, %arg4: memref<4x1xf32, #tpu.memory_space<vmem>>, %arg5: memref<1x4x256xf32, #tpu.memory_space<vmem>>) attributes {dimension_semantics = [#tpu.dimension_semantics<parallel>, #tpu.dimension_semantics<parallel>], iteration_bounds = array<i64: 2, 1>, scalar_prefetch = 0 : i64, scratch_operands = 0 : i64, tpu.core_type = #tpu.core_type<tc>, window_params = [{transform_indices = @transform_0, window_bounds = array<i64: 1, 4, 256>}, {transform_indices = @transform_1, window_bounds = array<i64: 4, 1>}, {transform_indices = @transform_2, window_bounds = array<i64: 4, 1>}, {transform_indices = @transform_3, window_bounds = array<i64: 1, 4, 256>}]} {
    %c0 = arith.constant 0 : index
    %c0_0 = arith.constant 0 : index
    %c0_1 = arith.constant 0 : index
    %0 = vector.load %arg2[%c0, %c0_0, %c0_1] : memref<1x4x256xf32, #tpu.memory_space<vmem>>, vector<1x4x256xf32>
    %cst = arith.constant dense<0.000000e+00> : vector<1x4xf32>
    %1 = vector.multi_reduction <add>, %0, %cst [2] : vector<1x4x256xf32> to vector<1x4xf32>
    %2 = vector.shape_cast %1 : vector<1x4xf32> to vector<1x4x1xf32>
    %cst_2 = arith.constant 3.906250e-03 : f32
    %3 = vector.broadcast %cst_2 : f32 to vector<1x4x1xf32>
    %4 = arith.mulf %2, %3 : vector<1x4x1xf32>
    %5 = arith.mulf %0, %0 : vector<1x4x256xf32>
    %cst_3 = arith.constant dense<0.000000e+00> : vector<1x4xf32>
    %6 = vector.multi_reduction <add>, %5, %cst_3 [2] : vector<1x4x256xf32> to vector<1x4xf32>
    %7 = vector.shape_cast %6 : vector<1x4xf32> to vector<1x4x1xf32>
    %cst_4 = arith.constant 3.906250e-03 : f32
    %8 = vector.broadcast %cst_4 : f32 to vector<1x4x1xf32>
    %9 = arith.mulf %7, %8 : vector<1x4x1xf32>
    %10 = arith.mulf %4, %4 : vector<1x4x1xf32>
    %11 = arith.subf %9, %10 : vector<1x4x1xf32>
    %cst_5 = arith.constant 0.000000e+00 : f32
    %12 = vector.broadcast %cst_5 : f32 to vector<1x4x1xf32>
    %13 = arith.maximumf %11, %12 : vector<1x4x1xf32>
    %cst_6 = arith.constant 9.99999974E-6 : f32
    %14 = vector.broadcast %cst_6 : f32 to vector<1x4x1xf32>
    %15 = arith.addf %13, %14 : vector<1x4x1xf32>
    %16 = math.rsqrt %15 : vector<1x4x1xf32>
    %c0_7 = arith.constant 0 : index
    %c0_8 = arith.constant 0 : index
    %17 = vector.load %arg3[%c0_7, %c0_8] : memref<4x1xf32, #tpu.memory_space<vmem>>, vector<4x1xf32>
    %18 = vector.shape_cast %17 : vector<4x1xf32> to vector<1x4x1xf32>
    %c0_9 = arith.constant 0 : index
    %c0_10 = arith.constant 0 : index
    %19 = vector.load %arg4[%c0_9, %c0_10] : memref<4x1xf32, #tpu.memory_space<vmem>>, vector<4x1xf32>
    %20 = vector.shape_cast %19 : vector<4x1xf32> to vector<1x4x1xf32>
    %c4_i32 = arith.constant 4 : i32
    %21 = arith.muli %arg1, %c4_i32 : i32
    %22 = tpu.iota {dimensions = array<i32: 1>} : vector<1x4x1xi32>
    %23 = vector.broadcast %21 : i32 to vector<1x4x1xi32>
    %24 = arith.addi %23, %22 : vector<1x4x1xi32>
    %c2_i32 = arith.constant 2 : i32
    %25 = vector.broadcast %c2_i32 : i32 to vector<1x4x1xi32>
    %26 = arith.cmpi slt, %24, %25 : vector<1x4x1xi32>
    %27 = arith.mulf %18, %16 : vector<1x4x1xf32>
    %28 = arith.select %26, %27, %18 : vector<1x4x1xi1>, vector<1x4x1xf32>
    %29 = arith.mulf %4, %28 : vector<1x4x1xf32>
    %30 = arith.subf %20, %29 : vector<1x4x1xf32>
    %31 = arith.select %26, %30, %20 : vector<1x4x1xi1>, vector<1x4x1xf32>
    %32 = vector.broadcast %28 : vector<1x4x1xf32> to vector<1x4x256xf32>
    %33 = arith.mulf %0, %32 : vector<1x4x256xf32>
    %34 = vector.broadcast %31 : vector<1x4x1xf32> to vector<1x4x256xf32>
    %35 = arith.addf %33, %34 : vector<1x4x256xf32>
    %c0_11 = arith.constant 0 : index
    %c0_12 = arith.constant 0 : index
    %c0_13 = arith.constant 0 : index
    %36 = vector.load %arg5[%c0_11, %c0_12, %c0_13] : memref<1x4x256xf32, #tpu.memory_space<vmem>>, vector<1x4x256xf32>
    tpu.vector_store %arg5[%c0_11, %c0_12, %c0_13], %35 {strides = array<i32>} : memref<1x4x256xf32, #tpu.memory_space<vmem>>, vector<1x4x256xf32>,
    return
  }
  func.func @transform_0(%arg0: i32, %arg1: i32) -> (i32, i32, i32) {
    %c0_i32 = arith.constant 0 : i32
    %c0_i32_0 = arith.constant 0 : i32
    return %arg0, %arg1, %c0_i32 : i32, i32, i32
  }
  func.func @transform_1(%arg0: i32, %arg1: i32) -> (i32, i32) {
    %c0_i32 = arith.constant 0 : i32
    %c0_i32_0 = arith.constant 0 : i32
    return %arg1, %c0_i32 : i32, i32
  }
  func.func @transform_2(%arg0: i32, %arg1: i32) -> (i32, i32) {
    %c0_i32 = arith.constant 0 : i32
    %c0_i32_0 = arith.constant 0 : i32
    return %arg1, %c0_i32 : i32, i32
  }
  func.func @transform_3(%arg0: i32, %arg1: i32) -> (i32, i32, i32) {
    %c0_i32 = arith.constant 0 : i32
    %c0_i32_0 = arith.constant 0 : i32
    return %arg0, %arg1, %c0_i32 : i32, i32, i32
  }
}

</mosaic_0001>

<bundles_post_ra>
// kernel: ibn_forward.2
= control target key start
LH: loop header
LB: loop body
LE: loop exit
PB: predicated region body
PF: predicated region fallthrough
CT: control target
= control target key end

     0   :  { %s453_s9 = smov 0   ;;  %s455_s10 = smov 0   ;;  %s493_s0 = inlined_call_operand.vmem [shape: f32[2,4,256], index: 0, kind: input, shape index: {}]   ;;  %s494_s1 = inlined_call_operand.vmem [shape: f32[2,4,1], index: 1, kind: output, shape index: {0}]   ;;  %s495_s2 = inlined_call_operand.vmem [shape: f32[2,4,1], index: 2, kind: output, shape index: {1}]  }
   0x1   :  { %s457_s11 = smov 0  }
   0x2 LB: > { %s32_s12 = sadd.s32 1, %s432_s10  ;;  %p382_p0 = scmp.ge.s32.totalorder %s436_s11, 1  ;;  %s436_s11 = sphi %s457_s11, %s13_s11   ;;  %s432_s10 = sphi %s455_s10, %s497_s10   ;;  %s428_s9 = sphi %s453_s9, %s496_s9  }
   0x3   : > { %p34_p1 = scmp.ge.s32.totalorder %s32_s12, 2  ;;  %p151_p2 = scmp.lt.s32.totalorder %s436_s11, 3 }
   0x5   : > { %s499_s12 = smov (%p34_p1, %s32_s12), 0  ;;  %p152_p3 = pnand %p382_p0, %p151_p2 }
   0x6   : > { %p191_p4 = scmp.lt.s32.totalorder (!%p152_p3), %s428_s9, 1 }
   0x7   : > { %155 = sbr.rel (%p152_p3) target bundleno = 153 (0x99), region = 24 }
   0xc   : > { %s501_s9 = smov (!%p191_p4, %s428_s9), 1  ;;  %v219_v0 = vlaneseq  ;;  %vm235_vm1 = vcmask 1043456   ;;  %vm248_vm2 = vcmask 3072  }
   0xd   : > { %s389_s13 = sshll.u32 %s501_s9, 3  ;;  %s385_s17 = sshll.u32 %s501_s9, 2 }
   0xe   : > { %s202_s16 = scalar_lea.vmem %s493_s0, %s389_s13  ;;  %v220_v2 = vshrl.u32 %v219_v0, 7  ;;  %s210_s20 = scalar_lea.vmem %s494_s1, %s385_s17 }
   0xf   : > { %v218_v1 = vld [vmem:[%s202_s16] sm:$0xff]  ;;  %s217_s23 = scalar_lea.vmem %s495_s2, %s385_s17 }
  0x10   : > { %228 = vst [vmem:[#allocation1] ss:$2 sm:$0xff] %v218_v1  ;;  %vm222_vm0 = vcmp.ge.s32.totalorder %v220_v2, 2 }
  0x17   : > { %v229_v3 = vld.sshfl [vmem:[#allocation1] sm:$0xff pattern:$0x75316420]  ;;  %v230_v4 = vld.sshfl [vmem:[#allocation1 + $0x8] sm:$0xff pattern:$0x75316420] }
  0x18   : > { %v233_v5 = vsel %vm222_vm0, %v229_v3, 0.0  ;;  %v234_v6 = vsel %vm222_vm0, %v230_v4, 0.0 }
  0x19   : > { %v236_v7 = vsel %vm235_vm1, %v233_v5, 0.0  ;;  %v237_v8 = vsel %vm235_vm1, %v234_v6, 0.0  ;;  %v241_v9 = vmul.f32 %v233_v5, %v233_v5  ;;  %v242_v10 = vmul.f32 %v234_v6, %v234_v6 }
  0x1a   : > { %v238_v11 = vadd.f32 %v237_v8, %v236_v7 }
  0x1b   : > { %v243_v12 = vsel %vm235_vm1, %v241_v9, 0.0  ;;  %v244_v13 = vsel %vm235_vm1, %v242_v10, 0.0 }
  0x1c   : > { %239 = vadd.xlane.f32.xlu0 %v238_v11  ;;  %v245_v14 = vadd.f32 %v244_v13, %v243_v12 }
  0x24   : > { %246 = vadd.xlane.f32.xlu0 %v245_v14 }
  0x8f   : > { %v240_v15 = vpop.xlane.xlu0 %239 }
  0x90   : > { %249 = vst.msk [vmem:[%s210_s20] sm:$0xf] %vm248_vm2, %v240_v15 }
  0x97   : > { %v247_v16 = vpop.xlane.xlu0 %246 }
  0x98   : > { %250 = vst.msk [vmem:[%s217_s23] sm:$0xf] %vm248_vm2, %v247_v16 }
  0x99 PF: > { %s13_s11 = sadd.s32 1, %s436_s11   ;;  %s496_s9 = smov %s432_s10 }
  0x9a   : > { %p10_p5 = scmp.ge.s32.totalorder %s13_s11, 4   ;;  %s497_s10 = smov %s499_s12 }
  0x9c   :  { %12 = sbr.rel (!%p10_p5) target bundleno = 2 (0x2), region = 66 }

// kernel: ibn_forward.3
= control target key start
LH: loop header
LB: loop body
LE: loop exit
PB: predicated region body
PF: predicated region fallthrough
CT: control target
= control target key end

     0   :  { %s530_s12 = smov 0   ;;  %s532_s13 = smov 0   ;;  %s576_s0 = inlined_call_operand.vmem [shape: f32[2,4,256], index: 0, kind: input, shape index: {}]   ;;  %s577_s1 = inlined_call_operand.vmem [shape: f32[4,1], index: 1, kind: input, shape index: {}]   ;;  %s578_s2 = inlined_call_operand.vmem [shape: f32[4,1], index: 2, kind: input, shape index: {}]   ;;  %s579_s3 = inlined_call_operand.vmem [shape: f32[2,4,256], index: 3, kind: output, shape index: {}]  }
   0x1   :  { %s534_s14 = smov 0  }
   0x2 LB: > { %s25_s15 = sadd.s32 1, %s502_s13  ;;  %p445_p0 = scmp.ge.s32.totalorder %s506_s14, 1  ;;  %s506_s14 = sphi %s534_s14, %s13_s14   ;;  %s502_s13 = sphi %s532_s13, %s581_s13   ;;  %s498_s12 = sphi %s530_s12, %s580_s12  }
   0x3   : > { %p27_p1 = scmp.ge.s32.totalorder %s25_s15, 2  ;;  %p175_p2 = scmp.lt.s32.totalorder %s506_s14, 3 }
   0x5   : > { %s583_s15 = smov (%p27_p1, %s25_s15), 0  ;;  %p176_p3 = pnand %p445_p0, %p175_p2 }
   0x6   : > { %p215_p4 = scmp.lt.s32.totalorder (!%p176_p3), %s498_s12, 1 }
   0x7   : > { %179 = sbr.rel (%p176_p3) target bundleno = 308 (0x134), region = 32 }
   0xc   : > { %s585_s12 = smov (!%p215_p4, %s498_s12), 1  ;;  %vm248_vm0 = vcmask 1043456   ;;  %v508_v12 = vmov 0   ;;  %v285_v24 = vlaneseq  ;;  %v282_v29 = vld [vmem:[%s577_s1] sm:$0xf] }
   0xd   : > { %s452_s16 = sshll.u32 %s585_s12, 3  ;;  %480 = vset.pattern.permute.xlu1 %v508_v12  ;;  %481 = vset.pattern.permute.xlu0 %v508_v12  ;;  %v283_v33 = vld [vmem:[%s578_s2] sm:$0xf]  ;;  %v509_v37 = vmov 839922192  }
   0xe   : > { %s223_s19 = scalar_lea.vmem %s576_s0, %s452_s16  ;;  %v286_v27 = vshrl.u32 %v285_v24, 7  ;;  %v300_v38 = vunpack.c.l.s4 %v509_v37  ;;  %s240_s26 = scalar_lea.vmem %s579_s3, %s452_s16 }
   0xf   : > { %v241_v0 = vld [vmem:[%s223_s19] sm:$0xff] }
  0x10   : > { %243 = vst [vmem:[#allocation1] ss:$2 sm:$0xff] %v241_v0  ;;  %v255_v1 = vmul.f32 %v241_v0, %v241_v0  ;;  %vm289_vm4 = vcmp.lt.s32.totalorder %v286_v27, 2  ;;  %v301_v40 = vunpack.c.0.s8 %v300_v38 }
  0x17   : > { %v244_v2 = vld.sshfl [vmem:[#allocation1] sm:$0xff pattern:$0x75316420]  ;;  %v245_v3 = vld.sshfl [vmem:[#allocation1 + $0x8] sm:$0xff pattern:$0x75316420] }
  0x18   : > { %v249_v4 = vsel %vm248_vm0, %v244_v2, 0.0  ;;  %v250_v5 = vsel %vm248_vm0, %v245_v3, 0.0  ;;  %257 = vst [vmem:[#allocation1] ss:$2 sm:$0xff] %v255_v1 }
  0x19   : > { %v251_v6 = vadd.f32 %v250_v5, %v249_v4 }
  0x1b   : > { %252 = vadd.xlane.f32.xlu0 %v251_v6 }
  0x1f   : > { %v258_v7 = vld.sshfl [vmem:[#allocation1] sm:$0xff pattern:$0x75316420]  ;;  %v259_v8 = vld.sshfl [vmem:[#allocation1 + $0x8] sm:$0xff pattern:$0x75316420] }
  0x20   : > { %v262_v9 = vsel %vm248_vm0, %v258_v7, 0.0  ;;  %v263_v10 = vsel %vm248_vm0, %v259_v8, 0.0 }
  0x21   : > { %v264_v11 = vadd.f32 %v263_v10, %v262_v9 }
  0x23   : > { %265 = vadd.xlane.f32.xlu0 %v264_v11 }
  0x8e   : > { %v253_v13 = vpop.xlane.xlu0 %252 }
  0x8f   : > { %v254_v14 = vmul.f32 0.00390625, %v253_v13 }
  0x91   : > { %v268_v16 = vmul.f32 %v254_v14, %v254_v14 }
  0x96   : > { %v266_v15 = vpop.xlane.xlu0 %265 }
  0x97   : > { %v267_v17 = vmul.f32 0.00390625, %v266_v15 }
  0x99   : > { %v269_v18 = vsub.f32 %v267_v17, %v268_v16 }
  0x9b   : > { %v270_v19 = vmax.f32 %v269_v18, 0.0 }
  0x9d   : > { %v271_v20 = vadd.f32 1e-05, %v270_v19 }
  0x9f   : > { %482 = vrsqrt.f32 %v271_v20  ;;  %vm278_vm2 = vweird.f32 %v271_v20 }
  0xa5   : > { %v483_v21 = vpop.eup %482 }
  0xa6   : > { %v273_v22 = vmul.f32 %v483_v21, %v271_v20  ;;  %vm279_vm1 = vweird.f32 %v483_v21 }
  0xa7   : > { %vm280_vm3 = vmor %vm278_vm2, %vm279_vm1 }
  0xa8   : > { %v274_v23 = vmul.f32 %v483_v21, %v273_v22 }
  0xaa   : > { %v275_v25 = vmul.f32 0.5, %v274_v23 }
  0xac   : > { %v276_v26 = vsub.f32 1.5, %v275_v25 }
  0xae   : > { %v277_v28 = vmul.f32 %v483_v21, %v276_v26 }
  0xb0   : > { %v281_v30 = vsel %vm280_vm3, %v483_v21, %v277_v28 }
  0xb1   : > { %v290_v31 = vmul.f32 %v282_v29, %v281_v30 }
  0xb3   : > { %v291_v32 = vsel %vm289_vm4, %v290_v31, %v282_v29 }
  0xb4   : > { %297 = vperm.xlu1 %480, %v291_v32   ;;  %v292_v34 = vmul.f32 %v291_v32, %v254_v14 }
  0xb6   : > { %v293_v35 = vsub.f32 %v283_v33, %v292_v34 }
  0xb8   : > { %v294_v36 = vsel %vm289_vm4, %v293_v35, %v283_v33 }
  0xbc   : > { %307 = vperm.xlu1 %480, %v294_v36  }
 0x126   : > { %v298_v39 = vpop.permute.xlu1 %297 }
 0x127   : > { %v302_v41 = vperm.slane %v298_v39, %v301_v40 }
 0x129   : > { %v304_v43 = vmul.f32 %v302_v41, %v241_v0 }
 0x12e   : > { %v308_v42 = vpop.permute.xlu1 %307 }
 0x12f   : > { %v312_v44 = vperm.slane %v308_v42, %v301_v40 }
 0x131   : > { %v314_v45 = vadd.f32 %v312_v44, %v304_v43 }
 0x133   : > { %315 = vst [vmem:[%s240_s26] sm:$0xff] %v314_v45 }
 0x134 PF: > { %s13_s14 = sadd.s32 1, %s506_s14   ;;  %s580_s12 = smov %s502_s13 }
 0x135   : > { %p10_p5 = scmp.ge.s32.totalorder %s13_s14, 4   ;;  %s581_s13 = smov %s583_s15 }
 0x137   :  { %12 = sbr.rel (!%p10_p5) target bundleno = 2 (0x2), region = 68 }

</bundles_post_ra>
